<compile_context>
chip_gen: v6e
topology: v6e:2x2x1
jax: 0.10.0
libtpu: 0.0.40
codegen_flags: <defaults>
</compile_context>

<pallas_src>
import numpy as np
import jax
import jax.numpy as jnp
from jax import lax
from jax.experimental import pallas as pl
from jax.experimental.pallas import tpu as pltpu

FILTER = 10
STRIDE = 10
PAD = 10
N_FILTERS = 2
CONV_OUTPUT_SIZE = 64
N_ACTIONS = 7 + 3 + 23 + 15          # key + mouse_button + mouse_x + mouse_y = 48
N_SNAPSHOT_EMBEDDING = N_ACTIONS

_GRAY = np.array([0.2989, 0.587, 0.114], np.float32)  # torchvision Grayscale

_VMEM = pl.BlockSpec(memory_space=pltpu.MemorySpace.VMEM)


def _elu(v):
    # ELU(alpha=1).  exp is clamped so the untaken branch never overflows.
    return jnp.where(v > 0, v, jnp.exp(jnp.minimum(v, 0.0)) - 1.0)


# ------------------------------- fused kernel -------------------------------

def _fused_kernel(p_ref, w1_ref, b1_ref, h_ref, b2_ref, wsel_ref, fcb_ref,
                  out_ref):
    # conv1 (+ folded grayscale) + ELU, patch axis on lanes:
    #   (F, C*k*k) @ (C*k*k, B*18*18) -> (F, 648).  Kept as an SSA value.
    y1 = _elu(
        jnp.dot(w1_ref[...], p_ref[...], preferred_element_type=jnp.float32)
        + b1_ref[...])

    # conv2 + ELU: H_c stored lane-dense as (16, 648); contract both operands
    # over their lane axis.  Border conv1 outputs are pre-folded into b2_ref.
    z = b2_ref[...]                                   # (1, 16)
    for c in range(N_FILTERS):                        # static unroll (F == 2)
        z = z + lax.dot_general(
            y1[c:c + 1, :], h_ref[c],
            dimension_numbers=(((1,), (1,)), ((), ())),
            preferred_element_type=jnp.float32)
    y2 = _elu(z)                                      # (1, 16)

    # fc1 over the 16 data-dependent conv2 outputs; the constant border
    # outputs are already folded into fcb_ref.
    out_ref[...] = (jnp.dot(y2, wsel_ref[...],
                            preferred_element_type=jnp.float32) + fcb_ref[...])


# --------------------- one-time parameter preprocessing ---------------------

def prepare_params(params, batch=2, channels=3, height=180, width=180):
    """Parameter-only preprocessing.  Call ONCE per weight set and reuse."""
    B, C, H, W = batch, channels, height, width
    F = N_FILTERS
    assert H % FILTER == 0 and W % FILTER == 0
    H1 = (H + 2 * PAD - FILTER) // STRIDE + 1        # 20
    W1 = (W + 2 * PAD - FILTER) // STRIDE + 1        # 20
    H2 = (H1 + 2 * PAD - FILTER) // STRIDE + 1       # 4
    W2 = (W1 + 2 * PAD - FILTER) // STRIDE + 1       # 4
    BH, BW = H1 // FILTER, W1 // FILTER              # interior conv2 blocks (2, 2)
    H1i, W1i = H // FILTER, W // FILTER              # data-dependent conv1 grid (18, 18)
    M1 = B * H1 * W1                                 # 800 (all conv1 positions)
    NB = B * BH * BW                                 # 8
    # torch.flatten(x) flattens batch too; the module hard-codes 64 inputs to fc1.
    assert B * F * H2 * W2 == CONV_OUTPUT_SIZE, (B, F, H2, W2)

    # conv1 weights with grayscale folded in, transposed (F, C*k*k)
    gray = jnp.asarray(_GRAY[:C])
    w1t = (params["conv1_w"][:, 0:1, :, :] * gray[None, :, None, None])
    w1t = w1t.reshape(F, C * FILTER * FILTER)                    # (2, 300)
    b1c = params["conv1_b"].reshape(F, 1)                        # (2, 1)

    # conv2 block weights over ALL conv1 positions p=(b,i,j):
    #   H[c, p, m*F+f] = w2[f, c, i%k, j%k] * [block(p) == m]
    p_idx = np.arange(M1)
    b_i = p_idx // (H1 * W1)
    i_i = (p_idx // W1) % H1
    j_i = p_idx % W1
    rk = i_i % FILTER
    sk = j_i % FILTER
    m_i = (b_i * BH + i_i // FILTER) * BW + j_i // FILTER
    onehot = np.zeros((M1, NB), np.float32)
    onehot[p_idx, m_i] = 1.0
    w2g = params["conv2_w"][:, :, rk, sk]                        # (F, F, 800)
    hfull = jnp.einsum("fcp,pm->cpmf", w2g,
                       jnp.asarray(onehot)).reshape(F, M1, NB * F)

    # interior / border split of the conv1 output grid (kernel==stride==pad:
    # border outputs are the constant elu(conv1_b) and never see input data).
    interior = (i_i >= 1) & (i_i <= H1i) & (j_i >= 1) & (j_i <= W1i)
    bb, ii, jj = np.meshgrid(np.arange(B), np.arange(H1i), np.arange(W1i),
                             indexing="ij")
    int_idx = (bb * (H1 * W1) + (ii + 1) * W1 + (jj + 1)).reshape(-1)  # (648,)
    # lane-dense storage: long 648 axis last  -> (F, 16, 648)
    hmat_t = jnp.transpose(hfull[:, int_idx, :], (0, 2, 1))

    elu_b1 = jax.nn.elu(params["conv1_b"])                       # (F,)
    h_border_sum = hfull[:, np.nonzero(~interior)[0], :].sum(axis=1)  # (F, 16)
    b2t = jnp.tile(params["conv2_b"], NB).reshape(1, NB * F)     # (1, 16)
    b2_eff = b2t + (elu_b1 @ h_border_sum).reshape(1, NB * F)

    # fc1: pick the 16 data-dependent conv2 outputs (in (m, f) order) and fold
    # the constant border outputs elu(conv2_b) into the bias.
    off = PAD // STRIDE                                          # 1
    mm = np.arange(NB)
    mb = mm // (BH * BW)
    pi2 = (mm // BW) % BH
    pj2 = mm % BW
    flat_idx = np.zeros(NB * F, np.int32)
    for m in range(NB):
        for f in range(F):
            flat_idx[m * F + f] = (
                ((mb[m] * F + f) * H2 + (off + pi2[m])) * W2 + (off + pj2[m]))
    wsel = params["fc1_w"][:, flat_idx].T                        # (16, 48)

    border2 = np.ones((H2, W2), np.float32)
    border2[off:off + BH, off:off + BW] = 0.0
    elu_b2 = jax.nn.elu(params["conv2_b"])
    v_border = jnp.asarray(border2)[None, None] * elu_b2[None, :, None, None]
    v_border = jnp.broadcast_to(v_border, (B, F, H2, W2)).reshape(-1)
    fcb = (params["fc1_b"] + params["fc1_w"] @ v_border).reshape(1, -1)

    return {"w1t": w1t, "b1c": b1c, "hmat_t": hmat_t, "b2_eff": b2_eff,
            "wsel": wsel, "fcb": fcb}


# ------------------------------ forward wrapper ------------------------------

@jax.jit
def image_model_forward(prepped, x):
    B, C, H, W = x.shape
    assert H % FILTER == 0 and W % FILTER == 0
    H1i, W1i = H // FILTER, W // FILTER              # 18, 18
    Mint = B * H1i * W1i                             # 648

    # Only per-call host work: regroup the UNPADDED input into the interior
    # conv1 patch matrix (rows (c,u,v), cols (b,ii,jj)).  No jnp.pad: the
    # all-zero padded patches were folded into the biases in prepare_params.
    pt = x.reshape(B, C, H1i, FILTER, W1i, FILTER)
    pt = pt.transpose(1, 3, 5, 0, 2, 4).reshape(C * FILTER * FILTER, Mint)

    out = pl.pallas_call(
        _fused_kernel,
        out_shape=jax.ShapeDtypeStruct((1, N_SNAPSHOT_EMBEDDING), jnp.float32),
        in_specs=[_VMEM] * 7,
        out_specs=_VMEM,
    )(pt, prepped["w1t"], prepped["b1c"], prepped["hmat_t"],
      prepped["b2_eff"], prepped["wsel"], prepped["fcb"])
    return out.reshape(-1)                                       # (48,)


# ------------------------------ params / reference ------------------------------

def init_params(key):
    ks = jax.random.split(key, 6)

    def uni(k, shape, fan_in):
        bound = 1.0 / jnp.sqrt(float(fan_in))
        return jax.random.uniform(k, shape, jnp.float32, -bound, bound)

    fan1 = 1 * FILTER * FILTER
    fan2 = N_FILTERS * FILTER * FILTER
    return {
        "conv1_w": uni(ks[0], (N_FILTERS, 1, FILTER, FILTER), fan1),
        "conv1_b": uni(ks[1], (N_FILTERS,), fan1),
        "conv2_w": uni(ks[2], (N_FILTERS, N_FILTERS, FILTER, FILTER), fan2),
        "conv2_b": uni(ks[3], (N_FILTERS,), fan2),
        "fc1_w": uni(ks[4], (N_SNAPSHOT_EMBEDDING, CONV_OUTPUT_SIZE), CONV_OUTPUT_SIZE),
        "fc1_b": uni(ks[5], (N_SNAPSHOT_EMBEDDING,), CONV_OUTPUT_SIZE),
    }


def reference_forward(params, x):
    """Pure-JAX reference (lax.conv) for verification."""
    g = 0.2989 * x[:, 0] + 0.587 * x[:, 1] + 0.114 * x[:, 2]
    y = lax.conv_general_dilated(g[:, None], params["conv1_w"],
                                 window_strides=(STRIDE, STRIDE),
                                 padding=[(PAD, PAD), (PAD, PAD)])
    y = jax.nn.elu(y + params["conv1_b"][None, :, None, None])
    y = lax.conv_general_dilated(y, params["conv2_w"],
                                 window_strides=(STRIDE, STRIDE),
                                 padding=[(PAD, PAD), (PAD, PAD)])
    y = jax.nn.elu(y + params["conv2_b"][None, :, None, None])
    flat = y.reshape(-1)
    return params["fc1_w"] @ flat + params["fc1_b"]


if __name__ == "__main__":
    key = jax.random.PRNGKey(0)
    k_param, k_x = jax.random.split(key)

    params = init_params(k_param)
    # (2, 3, 180, 180): batch-2 input whose flattened conv2 output is exactly
    # conv_output_size = 64, as required by the module's fc1.
    x = jax.random.normal(k_x, (2, 3, 180, 180), dtype=jnp.float32)

    # One-time, parameter-only preprocessing (reused across forward calls).
    prepped = prepare_params(params, batch=2, channels=3, height=180, width=180)

    out = jax.block_until_ready(image_model_forward(prepped, x))
    assert out.shape == (N_SNAPSHOT_EMBEDDING,), out.shape

    ref = jax.block_until_ready(reference_forward(params, x))
    assert jnp.allclose(out, ref, atol=1e-3, rtol=1e-3), (out, ref)

    print("KERNEL_OK")
</pallas_src>

<mosaic_0001>
module attributes {stable_mosaic.version = 11 : i64} {
  func.func @_fused_kernel(%arg0: memref<300x648xf32, #tpu.memory_space<vmem>>, %arg1: memref<2x300xf32, #tpu.memory_space<vmem>>, %arg2: memref<2x1xf32, #tpu.memory_space<vmem>>, %arg3: memref<2x16x648xf32, #tpu.memory_space<vmem>>, %arg4: memref<1x16xf32, #tpu.memory_space<vmem>>, %arg5: memref<16x48xf32, #tpu.memory_space<vmem>>, %arg6: memref<1x48xf32, #tpu.memory_space<vmem>>, %arg7: memref<1x48xf32, #tpu.memory_space<vmem>>) attributes {dimension_semantics = [], scalar_prefetch = 0 : i64, scratch_operands = 0 : i64, tpu.core_type = #tpu.core_type<tc>} {
    %c0 = arith.constant 0 : index
    %c0_0 = arith.constant 0 : index
    %0 = vector.load %arg1[%c0, %c0_0] : memref<2x300xf32, #tpu.memory_space<vmem>>, vector<2x300xf32>
    %c0_1 = arith.constant 0 : index
    %c0_2 = arith.constant 0 : index
    %1 = vector.load %arg0[%c0_1, %c0_2] : memref<300x648xf32, #tpu.memory_space<vmem>>, vector<300x648xf32>
    %cst = arith.constant dense<0.000000e+00> : vector<2x648xf32>
    %2 = tpu.matmul %0, %1, %cst {dimension_numbers = #tpu.dot_dimension_numbers<[1], [0], [0], [1], [0, 0, 1, 1], [], []>} : vector<2x300xf32>, vector<300x648xf32>, vector<2x648xf32> -> vector<2x648xf32>
    %c0_3 = arith.constant 0 : index
    %c0_4 = arith.constant 0 : index
    %3 = vector.load %arg2[%c0_3, %c0_4] : memref<2x1xf32, #tpu.memory_space<vmem>>, vector<2x1xf32>
    %4 = vector.broadcast %3 : vector<2x1xf32> to vector<2x648xf32>
    %5 = arith.addf %2, %4 : vector<2x648xf32>
    %cst_5 = arith.constant 0.000000e+00 : f32
    %6 = vector.broadcast %cst_5 : f32 to vector<2x648xf32>
    %7 = arith.cmpf ogt, %5, %6 : vector<2x648xf32>
    %cst_6 = arith.constant 0.000000e+00 : f32
    %8 = vector.broadcast %cst_6 : f32 to vector<2x648xf32>
    %9 = arith.minimumf %5, %8 : vector<2x648xf32>
    %10 = math.exp %9 : vector<2x648xf32>
    %cst_7 = arith.constant 1.000000e+00 : f32
    %11 = vector.broadcast %cst_7 : f32 to vector<2x648xf32>
    %12 = arith.subf %10, %11 : vector<2x648xf32>
    %13 = arith.select %7, %5, %12 : vector<2x648xi1>, vector<2x648xf32>
    %c0_8 = arith.constant 0 : index
    %c0_9 = arith.constant 0 : index
    %14 = vector.load %arg4[%c0_8, %c0_9] : memref<1x16xf32, #tpu.memory_space<vmem>>, vector<1x16xf32>
    %15 = vector.extract_strided_slice %13 {offsets = [0, 0], sizes = [1, 648], strides = [1, 1]} : vector<2x648xf32> to vector<1x648xf32>
    %c0_10 = arith.constant 0 : index
    %c0_11 = arith.constant 0 : index
    %c0_12 = arith.constant 0 : index
    %16 = vector.load %arg3[%c0_10, %c0_11, %c0_12] : memref<2x16x648xf32, #tpu.memory_space<vmem>>, vector<1x16x648xf32>
    %17 = vector.shape_cast %16 : vector<1x16x648xf32> to vector<16x648xf32>
    %cst_13 = arith.constant dense<0.000000e+00> : vector<1x16xf32>
    %18 = tpu.matmul %15, %17, %cst_13 {dimension_numbers = #tpu.dot_dimension_numbers<[1], [1], [0], [0], [0, 0, 1, 0], [], []>} : vector<1x648xf32>, vector<16x648xf32>, vector<1x16xf32> -> vector<1x16xf32>
    %19 = arith.addf %14, %18 : vector<1x16xf32>
    %20 = vector.extract_strided_slice %13 {offsets = [1, 0], sizes = [1, 648], strides = [1, 1]} : vector<2x648xf32> to vector<1x648xf32>
    %c1 = arith.constant 1 : index
    %c0_14 = arith.constant 0 : index
    %c0_15 = arith.constant 0 : index
    %21 = vector.load %arg3[%c1, %c0_14, %c0_15] : memref<2x16x648xf32, #tpu.memory_space<vmem>>, vector<1x16x648xf32>
    %22 = vector.shape_cast %21 : vector<1x16x648xf32> to vector<16x648xf32>
    %cst_16 = arith.constant dense<0.000000e+00> : vector<1x16xf32>
    %23 = tpu.matmul %20, %22, %cst_16 {dimension_numbers = #tpu.dot_dimension_numbers<[1], [1], [0], [0], [0, 0, 1, 0], [], []>} : vector<1x648xf32>, vector<16x648xf32>, vector<1x16xf32> -> vector<1x16xf32>
    %24 = arith.addf %19, %23 : vector<1x16xf32>
    %cst_17 = arith.constant 0.000000e+00 : f32
    %25 = vector.broadcast %cst_17 : f32 to vector<1x16xf32>
    %26 = arith.cmpf ogt, %24, %25 : vector<1x16xf32>
    %cst_18 = arith.constant 0.000000e+00 : f32
    %27 = vector.broadcast %cst_18 : f32 to vector<1x16xf32>
    %28 = arith.minimumf %24, %27 : vector<1x16xf32>
    %29 = math.exp %28 : vector<1x16xf32>
    %cst_19 = arith.constant 1.000000e+00 : f32
    %30 = vector.broadcast %cst_19 : f32 to vector<1x16xf32>
    %31 = arith.subf %29, %30 : vector<1x16xf32>
    %32 = arith.select %26, %24, %31 : vector<1x16xi1>, vector<1x16xf32>
    %c0_20 = arith.constant 0 : index
    %c0_21 = arith.constant 0 : index
    %33 = vector.load %arg5[%c0_20, %c0_21] : memref<16x48xf32, #tpu.memory_space<vmem>>, vector<16x48xf32>
    %cst_22 = arith.constant dense<0.000000e+00> : vector<1x48xf32>
    %34 = tpu.matmul %32, %33, %cst_22 {dimension_numbers = #tpu.dot_dimension_numbers<[1], [0], [0], [1], [0, 0, 1, 1], [], []>} : vector<1x16xf32>, vector<16x48xf32>, vector<1x48xf32> -> vector<1x48xf32>
    %c0_23 = arith.constant 0 : index
    %c0_24 = arith.constant 0 : index
    %35 = vector.load %arg6[%c0_23, %c0_24] : memref<1x48xf32, #tpu.memory_space<vmem>>, vector<1x48xf32>
    %36 = arith.addf %34, %35 : vector<1x48xf32>
    %c0_25 = arith.constant 0 : index
    %c0_26 = arith.constant 0 : index
    %37 = vector.load %arg7[%c0_25, %c0_26] : memref<1x48xf32, #tpu.memory_space<vmem>>, vector<1x48xf32>
    tpu.vector_store %arg7[%c0_25, %c0_26], %36 {strides = array<i32>} : memref<1x48xf32, #tpu.memory_space<vmem>>, vector<1x48xf32>,
    return
  }
}

</mosaic_0001>

<bundles_post_ra>
// kernel: image_model_forward.1
= control target key start
LH: loop header
LB: loop body
LE: loop exit
PB: predicated region body
PF: predicated region fallthrough
CT: control target
= control target key end

     0   :  { %vm284_vm0 = vcmask 1043456   ;;  %v267_v3 = vlaneseq  ;;  %v1434_v10 = vmov 1983009808   ;;  %vm281_vm1 = vcmask 359424   ;;  %s2315_s0 = inlined_call_operand.vmem [shape: f32[300,648], index: 0, kind: input, shape index: {}]   ;;  %s2316_s1 = inlined_call_operand.vmem [shape: f32[2,300], index: 1, kind: input, shape index: {}]   ;;  %s2317_s2 = inlined_call_operand.vmem [shape: f32[2,1], index: 2, kind: input, shape index: {}]   ;;  %s2318_s3 = inlined_call_operand.vmem [shape: f32[2,16,648], index: 3, kind: input, shape index: {}]   ;;  %s2319_s4 = inlined_call_operand.vmem [shape: f32[1,16], index: 4, kind: input, shape index: {}]   ;;  %s2320_s5 = inlined_call_operand.vmem [shape: f32[16,48], index: 5, kind: input, shape index: {}]   ;;  %s2321_s6 = inlined_call_operand.vmem [shape: f32[1,48], index: 6, kind: input, shape index: {}]   ;;  %s2322_s7 = inlined_call_operand.hbm [shape: f32[1,48], index: 7, kind: output, shape index: {}]  }
   0x1   :  { %v119_v0 = vld [vmem:[%s2315_s0 + $0x2d8] sm:$0xff]  ;;  %v118_v2 = vld [vmem:[%s2315_s0 + $0x2d0] sm:$0xff]  ;;  %v113_v5 = vld [vmem:[%s2315_s0 + $0x2a8] sm:$0xff]  ;;  %v265_v11 = vunpack.c.l.s4 %v1434_v10  ;;  %v1435_v37 = vmov 0.0  }
   0x2   :  { %v251_v1 = vld [vmem:[%s2315_s0 + $0x6f8] sm:$0xf]  ;;  %303 = vmatprep.subr.mxu0 %v119_v0  ;;  %v250_v4 = vld [vmem:[%s2315_s0 + $0x6f0] sm:$0xf]  ;;  %v245_v6 = vld [vmem:[%s2315_s0 + $0x6c8] sm:$0xff]  ;;  %v268_v18 = vshrl.u32 %v267_v3, 7  ;;  %438 = vmatprep.mubr.f32.mxu1 %v1435_v37 }
   0x3   :  { %1346 = vmatprep.subr.msk.mxu1 %vm284_vm0, %v251_v1  ;;  %304 = vmatpush1.msra.mxu0 %v118_v2  ;;  %v112_v7 = vld [vmem:[%s2315_s0 + $0x2a0] sm:$0xff]  ;;  %v107_v9 = vld [vmem:[%s2315_s0 + $0x278] sm:$0xff]  ;;  %v106_v13 = vld [vmem:[%s2315_s0 + $0x270] sm:$0xff]  ;;  %v266_v17 = vunpack.c.0.s8 %v265_v11 }
   0x4   :  { %1347 = vmatpush1.msk.msra.mxu1 %vm284_vm0, %v250_v4  ;;  %v244_v8 = vld [vmem:[%s2315_s0 + $0x6c0] sm:$0xff]  ;;  %305 = vmatprep.subr.mxu0 %v113_v5  ;;  %v239_v12 = vld [vmem:[%s2315_s0 + $0x698] sm:$0xff]  ;;  %v238_v14 = vld [vmem:[%s2315_s0 + $0x690] sm:$0xff] }
   0x5   :  { %396 = vmatprep.subr.mxu1 %v245_v6  ;;  %306 = vmatpush1.msra.mxu0 %v112_v7  ;;  %v101_v15 = vld [vmem:[%s2315_s0 + $0x248] sm:$0xff]  ;;  %v100_v19 = vld [vmem:[%s2315_s0 + $0x240] sm:$0xff]  ;;  %v95_v21 = vld [vmem:[%s2315_s0 + $0x218] sm:$0xff]  ;;  %v1547_v27 = vsub.s32 %v266_v17, %v268_v18 }
   0x6   :  { %397 = vmatpush1.msra.mxu1 %v244_v8  ;;  %v233_v16 = vld [vmem:[%s2315_s0 + $0x668] sm:$0xff]  ;;  %307 = vmatprep.subr.mxu0 %v107_v9  ;;  %v232_v20 = vld [vmem:[%s2315_s0 + $0x660] sm:$0xff]  ;;  %v227_v22 = vld [vmem:[%s2315_s0 + $0x638] sm:$0xff] }
   0x7   :  { %398 = vmatprep.subr.mxu1 %v239_v12  ;;  %308 = vmatpush1.msra.mxu0 %v106_v13  ;;  %v94_v23 = vld [vmem:[%s2315_s0 + $0x210] sm:$0xff]  ;;  %v89_v25 = vld [vmem:[%s2315_s0 + $0x1e8] sm:$0xff]  ;;  %v88_v28 = vld [vmem:[%s2315_s0 + $0x1e0] sm:$0xff] }
   0x8   :  { %399 = vmatpush1.msra.mxu1 %v238_v14  ;;  %309 = vmatprep.subr.mxu0 %v101_v15  ;;  %v226_v24 = vld [vmem:[%s2315_s0 + $0x630] sm:$0xff]  ;;  %v221_v26 = vld [vmem:[%s2315_s0 + $0x608] sm:$0xff]  ;;  %v220_v29 = vld [vmem:[%s2315_s0 + $0x600] sm:$0xff] }
   0x9   :  { %400 = vmatprep.subr.mxu1 %v233_v16  ;;  %310 = vmatpush1.msra.mxu0 %v100_v19  ;;  %v1558_v30 = vld [vmem:[%s2316_s1] sm:$0x3f]  ;;  %v83_v31 = vld [vmem:[%s2315_s0 + $0x1b8] sm:$0xff]  ;;  %v121_v33 = vld [vmem:[%s2315_s0 + $0x2e8] sm:$0xff] }
   0xa   :  { %401 = vmatpush1.msra.mxu1 %v232_v20  ;;  %311 = vmatprep.subr.mxu0 %v95_v21  ;;  %v263_v32 = vcombine.high %v1558_v30, %v1558_v30  ;;  %v82_v34 = vld [vmem:[%s2315_s0 + $0x1b0] sm:$0xff]  ;;  %v77_v36 = vld [vmem:[%s2315_s0 + $0x188] sm:$0xff]  ;;  %v120_v38 = vld [vmem:[%s2315_s0 + $0x2e0] sm:$0xff] }
   0xb   :  { %402 = vmatprep.subr.mxu1 %v227_v22  ;;  %312 = vmatpush1.msra.mxu0 %v94_v23  ;;  %v76_v39 = vld [vmem:[%s2315_s0 + $0x180] sm:$0xff]  ;;  %v115_v40 = vld [vmem:[%s2315_s0 + $0x2b8] sm:$0xff]  ;;  %v114_v42 = vld [vmem:[%s2315_s0 + $0x2b0] sm:$0xff] }
   0xc   :  { %403 = vmatpush1.msra.mxu1 %v226_v24  ;;  %313 = vmatprep.subr.mxu0 %v89_v25  ;;  %v1572_v35 = vrot.slane %v263_v32, %v1547_v27  ;;  %v71_v41 = vld [vmem:[%s2315_s0 + $0x158] sm:$0xff]  ;;  %v70_v43 = vld [vmem:[%s2315_s0 + $0x150] sm:$0xff]  ;;  %v109_v44 = vld [vmem:[%s2315_s0 + $0x288] sm:$0xff] }
   0xd   :  { %404 = vmatprep.subr.mxu1 %v221_v26  ;;  %314 = vmatpush1.msra.mxu0 %v88_v28  ;;  %v65_v45 = vld [vmem:[%s2315_s0 + $0x128] sm:$0xff]  ;;  %v108_v46 = vld [vmem:[%s2315_s0 + $0x280] sm:$0xff]  ;;  %v103_v48 = vld [vmem:[%s2315_s0 + $0x258] sm:$0xff] }
   0xe   :  { %405 = vmatpush1.msra.mxu1 %v220_v29  ;;  %315 = vmatprep.subr.mxu0 %v83_v31  ;;  %v64_v47 = vld [vmem:[%s2315_s0 + $0x120] sm:$0xff]  ;;  %v59_v49 = vld [vmem:[%s2315_s0 + $0xf8] sm:$0xff]  ;;  %v102_v50 = vld [vmem:[%s2315_s0 + $0x250] sm:$0xff] }
   0xf   :  { %445 = vmatprep.subr.mxu1 %v121_v33  ;;  %316 = vmatpush1.msra.mxu0 %v82_v34  ;;  %v58_v51 = vld [vmem:[%s2315_s0 + $0xf0] sm:$0xff]  ;;  %v97_v52 = vld [vmem:[%s2315_s0 + $0x228] sm:$0xff]  ;;  %v96_v54 = vld [vmem:[%s2315_s0 + $0x220] sm:$0xff] }
  0x10   :  { %1348 = vmatmul.mubr.msk.f32.vlgmr.msra.gmra.mxu1 %vm281_vm1, %v1572_v35  ;;  %317 = vmatprep.subr.mxu0 %v77_v36  ;;  %v53_v53 = vld [vmem:[%s2315_s0 + $0xc8] sm:$0xff]  ;;  %v52_v55 = vld [vmem:[%s2315_s0 + $0xc0] sm:$0xff]  ;;  %v91_v56 = vld [vmem:[%s2315_s0 + $0x1f8] sm:$0xff] }
  0x11   :  { %446 = vmatpush1.msra.mxu1 %v120_v38  ;;  %318 = vmatpush1.msra.mxu0 %v76_v39  ;;  %v47_v57 = vld [vmem:[%s2315_s0 + $0x98] sm:$0xff]  ;;  %v90_v58 = vld [vmem:[%s2315_s0 + $0x1f0] sm:$0xff]  ;;  %v85_v60 = vld [vmem:[%s2315_s0 + $0x1c8] sm:$0xff] }
  0x12   :  { %447 = vmatprep.subr.mxu1 %v115_v40  ;;  %319 = vmatprep.subr.mxu0 %v71_v41  ;;  %v46_v59 = vld [vmem:[%s2315_s0 + $0x90] sm:$0xff]  ;;  %v41_v61 = vld [vmem:[%s2315_s0 + $0x68] sm:$0xff]  ;;  %v84_v62 = vld [vmem:[%s2315_s0 + $0x1c0] sm:$0xff] }
  0x13   :  { %448 = vmatpush1.msra.mxu1 %v114_v42  ;;  %320 = vmatpush1.msra.mxu0 %v70_v43  ;;  %v40_v63 = vld [vmem:[%s2315_s0 + $0x60] sm:$0xff]  ;;  %v79_v0 = vld [vmem:[%s2315_s0 + $0x198] sm:$0xff]  ;;  %v78_v2 = vld [vmem:[%s2315_s0 + $0x190] sm:$0xff] }
  0x14   :  { %449 = vmatprep.subr.mxu1 %v109_v44  ;;  %321 = vmatprep.subr.mxu0 %v65_v45  ;;  %v35_v1 = vld [vmem:[%s2315_s0 + $0x38] sm:$0xff]  ;;  %v34_v3 = vld [vmem:[%s2315_s0 + $0x30] sm:$0xff]  ;;  %v73_v4 = vld [vmem:[%s2315_s0 + $0x168] sm:$0xff] }
  0x15   :  { %450 = vmatpush1.msra.mxu1 %v108_v46  ;;  %322 = vmatpush1.msra.mxu0 %v64_v47  ;;  %v29_v5 = vld [vmem:[%s2315_s0 + $0x8] sm:$0xff]  ;;  %v72_v6 = vld [vmem:[%s2315_s0 + $0x160] sm:$0xff]  ;;  %v67_v8 = vld [vmem:[%s2315_s0 + $0x138] sm:$0xff] }
  0x16   :  { %451 = vmatprep.subr.mxu1 %v103_v48  ;;  %323 = vmatprep.subr.mxu0 %v59_v49  ;;  %v28_v7 = vld [vmem:[%s2315_s0] sm:$0xff]  ;;  %v215_v9 = vld [vmem:[%s2315_s0 + $0x5d8] sm:$0xff]  ;;  %v66_v10 = vld [vmem:[%s2315_s0 + $0x130] sm:$0xff] }
  0x17   :  { %452 = vmatpush1.msra.mxu1 %v102_v50  ;;  %324 = vmatpush1.msra.mxu0 %v58_v51  ;;  %v214_v11 = vld [vmem:[%s2315_s0 + $0x5d0] sm:$0xff]  ;;  %v61_v12 = vld [vmem:[%s2315_s0 + $0x108] sm:$0xff]  ;;  %v60_v14 = vld [vmem:[%s2315_s0 + $0x100] sm:$0xff] }
  0x18   :  { %453 = vmatprep.subr.mxu1 %v97_v52  ;;  %325 = vmatprep.subr.mxu0 %v53_v53  ;;  %v209_v13 = vld [vmem:[%s2315_s0 + $0x5a8] sm:$0xff]  ;;  %v208_v15 = vld [vmem:[%s2315_s0 + $0x5a0] sm:$0xff]  ;;  %v55_v16 = vld [vmem:[%s2315_s0 + $0xd8] sm:$0xff] }
  0x19   :  { %454 = vmatpush1.msra.mxu1 %v96_v54  ;;  %326 = vmatpush1.msra.mxu0 %v52_v55  ;;  %v203_v17 = vld [vmem:[%s2315_s0 + $0x578] sm:$0xff]  ;;  %v54_v18 = vld [vmem:[%s2315_s0 + $0xd0] sm:$0xff]  ;;  %v49_v20 = vld [vmem:[%s2315_s0 + $0xa8] sm:$0xff] }
  0x1a   :  { %455 = vmatprep.subr.mxu1 %v91_v56  ;;  %327 = vmatprep.subr.mxu0 %v47_v57  ;;  %v202_v19 = vld [vmem:[%s2315_s0 + $0x570] sm:$0xff]  ;;  %v197_v21 = vld [vmem:[%s2315_s0 + $0x548] sm:$0xff]  ;;  %v48_v22 = vld [vmem:[%s2315_s0 + $0xa0] sm:$0xff] }
  0x1b   :  { %456 = vmatpush1.msra.mxu1 %v90_v58  ;;  %328 = vmatpush1.msra.mxu0 %v46_v59  ;;  %v196_v23 = vld [vmem:[%s2315_s0 + $0x540] sm:$0xff]  ;;  %v43_v24 = vld [vmem:[%s2315_s0 + $0x78] sm:$0xff]  ;;  %v42_v26 = vld [vmem:[%s2315_s0 + $0x70] sm:$0xff] }
  0x1c   :  { %457 = vmatprep.subr.mxu1 %v85_v60  ;;  %329 = vmatprep.subr.mxu0 %v41_v61  ;;  %v191_v25 = vld [vmem:[%s2315_s0 + $0x518] sm:$0xff]  ;;  %v190_v28 = vld [vmem:[%s2315_s0 + $0x510] sm:$0xff]  ;;  %v37_v29 = vld [vmem:[%s2315_s0 + $0x48] sm:$0xff] }
  0x1d   :  { %458 = vmatpush1.msra.mxu1 %v84_v62  ;;  %330 = vmatpush1.msra.mxu0 %v40_v63  ;;  %v185_v31 = vld [vmem:[%s2315_s0 + $0x4e8] sm:$0xff]  ;;  %v36_v32 = vld [vmem:[%s2315_s0 + $0x40] sm:$0xff]  ;;  %v31_v34 = vld [vmem:[%s2315_s0 + $0x18] sm:$0xff] }
  0x1e   :  { %459 = vmatprep.subr.mxu1 %v79_v0  ;;  %331 = vmatprep.subr.mxu0 %v35_v1  ;;  %v184_v33 = vld [vmem:[%s2315_s0 + $0x4e0] sm:$0xff]  ;;  %v179_v36 = vld [vmem:[%s2315_s0 + $0x4b8] sm:$0xff]  ;;  %v30_v38 = vld [vmem:[%s2315_s0 + $0x10] sm:$0xff] }
  0x1f   :  { %460 = vmatpush1.msra.mxu1 %v78_v2  ;;  %332 = vmatpush1.msra.mxu0 %v34_v3  ;;  %v178_v39 = vld [vmem:[%s2315_s0 + $0x4b0] sm:$0xff]  ;;  %v217_v40 = vld [vmem:[%s2315_s0 + $0x5e8] sm:$0xff]  ;;  %v216_v42 = vld [vmem:[%s2315_s0 + $0x5e0] sm:$0xff]  ;;  %v1846_v2 = vrot.slane %v1558_v30, %v1547_v27 }
  0x20   :  { %461 = vmatprep.subr.mxu1 %v73_v4  ;;  %333 = vmatprep.subr.mxu0 %v29_v5  ;;  %v173_v41 = vld [vmem:[%s2315_s0 + $0x488] sm:$0xff]  ;;  %v172_v43 = vld [vmem:[%s2315_s0 + $0x480] sm:$0xff]  ;;  %v211_v44 = vld [vmem:[%s2315_s0 + $0x5b8] sm:$0xff] }
  0x21   :  { %462 = vmatpush1.msra.mxu1 %v72_v6  ;;  %334 = vmatpush1.msra.mxu0 %v28_v7  ;;  %v167_v45 = vld [vmem:[%s2315_s0 + $0x458] sm:$0xff]  ;;  %v210_v46 = vld [vmem:[%s2315_s0 + $0x5b0] sm:$0xff]  ;;  %v205_v48 = vld [vmem:[%s2315_s0 + $0x588] sm:$0xff] }
  0x22   :  { %463 = vmatprep.subr.mxu1 %v67_v8  ;;  %335 = vmatprep.subr.mxu0 %v215_v9  ;;  %v166_v47 = vld [vmem:[%s2315_s0 + $0x450] sm:$0xff]  ;;  %v161_v49 = vld [vmem:[%s2315_s0 + $0x428] sm:$0xff]  ;;  %v204_v50 = vld [vmem:[%s2315_s0 + $0x580] sm:$0xff] }
  0x23   :  { %464 = vmatpush1.msra.mxu1 %v66_v10  ;;  %336 = vmatpush2.msra.mxu0 %v214_v11  ;;  %v160_v51 = vld [vmem:[%s2315_s0 + $0x420] sm:$0xff]  ;;  %v199_v52 = vld [vmem:[%s2315_s0 + $0x558] sm:$0xff]  ;;  %v198_v54 = vld [vmem:[%s2315_s0 + $0x550] sm:$0xff]  ;;  %v1880_v11 = vcombine.high %v1846_v2, %v1846_v2 }
  0x24   :  { %465 = vmatprep.subr.mxu1 %v61_v12  ;;  %337 = vmatprep.subr.mxu0 %v209_v13  ;;  %v155_v53 = vld [vmem:[%s2315_s0 + $0x3f8] sm:$0xff]  ;;  %v154_v55 = vld [vmem:[%s2315_s0 + $0x3f0] sm:$0xff]  ;;  %v193_v56 = vld [vmem:[%s2315_s0 + $0x528] sm:$0xff] }
  0x25   :  { %466 = vmatpush1.msra.mxu1 %v60_v14  ;;  %338 = vmatpush2.msra.mxu0 %v208_v15  ;;  %v149_v57 = vld [vmem:[%s2315_s0 + $0x3c8] sm:$0xff]  ;;  %v192_v58 = vld [vmem:[%s2315_s0 + $0x520] sm:$0xff]  ;;  %v187_v60 = vld [vmem:[%s2315_s0 + $0x4f8] sm:$0xff] }
  0x26   :  { %467 = vmatprep.subr.mxu1 %v55_v16  ;;  %339 = vmatprep.subr.mxu0 %v203_v17  ;;  %v148_v59 = vld [vmem:[%s2315_s0 + $0x3c0] sm:$0xff]  ;;  %v143_v61 = vld [vmem:[%s2315_s0 + $0x398] sm:$0xff]  ;;  %v186_v62 = vld [vmem:[%s2315_s0 + $0x4f0] sm:$0xff] }
  0x27   :  { %468 = vmatpush1.msra.mxu1 %v54_v18  ;;  %340 = vmatpush2.msra.mxu0 %v202_v19  ;;  %v142_v63 = vld [vmem:[%s2315_s0 + $0x390] sm:$0xff]  ;;  %v181_v0 = vld [vmem:[%s2315_s0 + $0x4c8] sm:$0xff]  ;;  %v180_v3 = vld [vmem:[%s2315_s0 + $0x4c0] sm:$0xff] }
  0x28   :  { %469 = vmatprep.subr.mxu1 %v49_v20  ;;  %341 = vmatprep.subr.mxu0 %v197_v21  ;;  %v137_v1 = vld [vmem:[%s2315_s0 + $0x368] sm:$0xff]  ;;  %v136_v4 = vld [vmem:[%s2315_s0 + $0x360] sm:$0xff]  ;;  %v175_v5 = vld [vmem:[%s2315_s0 + $0x498] sm:$0xff] }
  0x29   :  { %470 = vmatpush1.msra.mxu1 %v48_v22  ;;  %342 = vmatpush2.msra.mxu0 %v196_v23  ;;  %v131_v27 = vld [vmem:[%s2315_s0 + $0x338] sm:$0xff]  ;;  %v174_v30 = vld [vmem:[%s2315_s0 + $0x490] sm:$0xff]  ;;  %v169_v7 = vld [vmem:[%s2315_s0 + $0x468] sm:$0xff] }
  0x2a   :  { %471 = vmatprep.subr.mxu1 %v43_v24  ;;  %343 = vmatprep.subr.mxu0 %v191_v25  ;;  %v130_v6 = vld [vmem:[%s2315_s0 + $0x330] sm:$0xff]  ;;  %v125_v8 = vld [vmem:[%s2315_s0 + $0x308] sm:$0xff]  ;;  %v168_v9 = vld [vmem:[%s2315_s0 + $0x460] sm:$0xff] }
  0x2b   :  { %472 = vmatpush1.msra.mxu1 %v42_v26  ;;  %344 = vmatpush2.msra.mxu0 %v190_v28  ;;  %v124_v10 = vld [vmem:[%s2315_s0 + $0x300] sm:$0xff]  ;;  %v163_v12 = vld [vmem:[%s2315_s0 + $0x438] sm:$0xff]  ;;  %v162_v13 = vld [vmem:[%s2315_s0 + $0x430] sm:$0xff] }
  0x2c   :  { %473 = vmatprep.subr.mxu1 %v37_v29  ;;  %345 = vmatprep.subr.mxu0 %v185_v31  ;;  %v157_v14 = vld [vmem:[%s2315_s0 + $0x408] sm:$0xff]  ;;  %v156_v16 = vld [vmem:[%s2315_s0 + $0x400] sm:$0xff]  ;;  %v151_v18 = vld [vmem:[%s2315_s0 + $0x3d8] sm:$0xff] }
  0x2d   :  { %474 = vmatpush1.msra.mxu1 %v36_v32  ;;  %346 = vmatpush2.msra.mxu0 %v184_v33  ;;  %v253_v15 = vld [vmem:[%s2315_s0 + $0x708] sm:$0xf]  ;;  %v252_v17 = vld [vmem:[%s2315_s0 + $0x700] sm:$0xf]  ;;  %v247_v19 = vld [vmem:[%s2315_s0 + $0x6d8] sm:$0xff] }
  0x2e   :  { %475 = vmatprep.subr.mxu1 %v31_v34  ;;  %347 = vmatprep.subr.mxu0 %v179_v36  ;;  %v150_v20 = vld [vmem:[%s2315_s0 + $0x3d0] sm:$0xff]  ;;  %v145_v22 = vld [vmem:[%s2315_s0 + $0x3a8] sm:$0xff]  ;;  %v144_v24 = vld [vmem:[%s2315_s0 + $0x3a0] sm:$0xff] }
  0x2f   :  { %476 = vmatpush1.msra.mxu1 %v30_v38  ;;  %348 = vmatpush2.msra.mxu0 %v178_v39  ;;  %v246_v21 = vld [vmem:[%s2315_s0 + $0x6d0] sm:$0xff]  ;;  %v241_v23 = vld [vmem:[%s2315_s0 + $0x6a8] sm:$0xff]  ;;  %v240_v25 = vld [vmem:[%s2315_s0 + $0x6a0] sm:$0xff] }
  0x30   :  { %477 = vmatprep.subr.mxu1 %v217_v40  ;;  %349 = vmatprep.subr.mxu0 %v173_v41  ;;  %v139_v26 = vld [vmem:[%s2315_s0 + $0x378] sm:$0xff]  ;;  %v138_v29 = vld [vmem:[%s2315_s0 + $0x370] sm:$0xff]  ;;  %v133_v32 = vld [vmem:[%s2315_s0 + $0x348] sm:$0xff] }
  0x31   :  { %478 = vmatpush2.msra.mxu1 %v216_v42  ;;  %350 = vmatpush2.msra.mxu0 %v172_v43  ;;  %v235_v28 = vld [vmem:[%s2315_s0 + $0x678] sm:$0xff]  ;;  %v234_v31 = vld [vmem:[%s2315_s0 + $0x670] sm:$0xff]  ;;  %v229_v33 = vld [vmem:[%s2315_s0 + $0x648] sm:$0xff] }
  0x32   :  { %479 = vmatprep.subr.mxu1 %v211_v44  ;;  %351 = vmatprep.subr.mxu0 %v167_v45  ;;  %v132_v34 = vld [vmem:[%s2315_s0 + $0x340] sm:$0xff]  ;;  %v127_v38 = vld [vmem:[%s2315_s0 + $0x318] sm:$0xff]  ;;  %v126_v40 = vld [vmem:[%s2315_s0 + $0x310] sm:$0xff] }
  0x33   :  { %480 = vmatpush2.msra.mxu1 %v210_v46  ;;  %352 = vmatpush2.msra.mxu0 %v166_v47  ;;  %v228_v36 = vld [vmem:[%s2315_s0 + $0x640] sm:$0xff]  ;;  %v223_v39 = vld [vmem:[%s2315_s0 + $0x618] sm:$0xff]  ;;  %v222_v41 = vld [vmem:[%s2315_s0 + $0x610] sm:$0xff] }
  0x34   :  { %481 = vmatprep.subr.mxu1 %v205_v48  ;;  %353 = vmatprep.subr.mxu0 %v161_v49 }
  0x35   :  { %482 = vmatpush2.msra.mxu1 %v204_v50  ;;  %354 = vmatpush2.msra.mxu0 %v160_v51 }
  0x36   :  { %483 = vmatprep.subr.mxu1 %v199_v52  ;;  %355 = vmatprep.subr.mxu0 %v155_v53 }
  0x37   :  { %484 = vmatpush2.msra.mxu1 %v198_v54  ;;  %356 = vmatpush2.msra.mxu0 %v154_v55 }
  0x38   :  { %485 = vmatprep.subr.mxu1 %v193_v56  ;;  %357 = vmatprep.subr.mxu0 %v149_v57 }
  0x39   :  { %486 = vmatpush2.msra.mxu1 %v192_v58  ;;  %358 = vmatpush2.msra.mxu0 %v148_v59 }
  0x3a   :  { %487 = vmatprep.subr.mxu1 %v187_v60  ;;  %359 = vmatprep.subr.mxu0 %v143_v61 }
  0x3b   :  { %488 = vmatpush2.msra.mxu1 %v186_v62  ;;  %360 = vmatpush2.msra.mxu0 %v142_v63 }
  0x3c   :  { %489 = vmatprep.subr.mxu1 %v181_v0  ;;  %361 = vmatprep.subr.mxu0 %v137_v1 }
  0x3d   :  { %490 = vmatpush2.msra.mxu1 %v180_v3  ;;  %362 = vmatpush2.msra.mxu0 %v136_v4 }
  0x3e   :  { %491 = vmatprep.subr.mxu1 %v175_v5  ;;  %363 = vmatprep.subr.mxu0 %v131_v27 }
  0x3f   :  { %492 = vmatpush2.msra.mxu1 %v174_v30  ;;  %364 = vmatpush2.msra.mxu0 %v130_v6 }
  0x40   :  { %493 = vmatprep.subr.mxu1 %v169_v7  ;;  %365 = vmatprep.subr.mxu0 %v125_v8 }
  0x41   :  { %494 = vmatpush2.msra.mxu1 %v168_v9  ;;  %366 = vmatpush2.msra.mxu0 %v124_v10 }
  0x42   :  { %495 = vmatprep.subr.mxu1 %v163_v12  ;;  %367 = vmatprep.mubr.f32.mxu0 %v1880_v11 }
  0x43   :  { %496 = vmatpush2.msra.mxu1 %v162_v13  ;;  %368 = vmatmul.mubr.f32.vlgmr.msra.gmra.mxu0 %v1846_v2 }
  0x44   :  { %497 = vmatprep.subr.mxu1 %v157_v14  ;;  %1349 = vmatprep.subr.msk.mxu0 %vm284_vm0, %v253_v15 }
  0x45   :  { %498 = vmatpush2.msra.mxu1 %v156_v16  ;;  %1350 = vmatpush1.msk.msra.mxu0 %vm284_vm0, %v252_v17 }
  0x46   :  { %499 = vmatprep.subr.mxu1 %v151_v18  ;;  %538 = vmatprep.subr.mxu0 %v247_v19 }
  0x47   :  { %500 = vmatpush2.msra.mxu1 %v150_v20  ;;  %539 = vmatpush1.msra.mxu0 %v246_v21 }
  0x48   :  { %501 = vmatprep.subr.mxu1 %v145_v22  ;;  %540 = vmatprep.subr.mxu0 %v241_v23 }
  0x49   :  { %502 = vmatpush2.msra.mxu1 %v144_v24  ;;  %541 = vmatpush1.msra.mxu0 %v240_v25 }
  0x4a   :  { %503 = vmatprep.subr.mxu1 %v139_v26  ;;  %542 = vmatprep.subr.mxu0 %v235_v28 }
  0x4b   :  { %504 = vmatpush2.msra.mxu1 %v138_v29  ;;  %543 = vmatpush1.msra.mxu0 %v234_v31 }
  0x4c   :  { %505 = vmatprep.subr.mxu1 %v133_v32  ;;  %544 = vmatprep.subr.mxu0 %v229_v33 }
  0x4d   :  { %506 = vmatpush2.msra.mxu1 %v132_v34  ;;  %545 = vmatpush1.msra.mxu0 %v228_v36 }
  0x4e   :  { %12 = vsyncpa [#allocation3], 0  ;;  %507 = vmatprep.subr.mxu1 %v127_v38  ;;  %546 = vmatprep.subr.mxu0 %v223_v39  ;;  %v123_v42 = vld [vmem:[%s2315_s0 + $0x2f8] sm:$0xff]  ;;  %v122_v44 = vld [vmem:[%s2315_s0 + $0x2f0] sm:$0xff]  ;;  %v1436_v56 = vmov 0   ;;  %vm778_vm4 = vcmask 64512  }
  0x4f   :  { %508 = vmatpush2.msra.mxu1 %v126_v40  ;;  %509 = vmatprep.mubr.f32.mxu1 %v1880_v11  ;;  %v255_v43 = vld [vmem:[%s2315_s0 + $0x718] sm:$0xf]  ;;  %v254_v45 = vld [vmem:[%s2315_s0 + $0x710] sm:$0xf]  ;;  %v117_v46 = vld [vmem:[%s2315_s0 + $0x2c8] sm:$0xff]  ;;  %vm1437_vm9 = vmmov 0  }
  0x50   :  { %547 = vmatpush1.msra.mxu0 %v222_v41  ;;  %580 = vmatprep.mubr.f32.mxu0 %v1435_v37  ;;  %v249_v47 = vld [vmem:[%s2315_s0 + $0x6e8] sm:$0xff]  ;;  %v116_v48 = vld [vmem:[%s2315_s0 + $0x2c0] sm:$0xff]  ;;  %v111_v50 = vld [vmem:[%s2315_s0 + $0x298] sm:$0xff]  ;;  %vm1256_vm10 = vcmask 130048   ;;  %vm1330_vm12 = vcmask 385024  }
  0x51   :  { %510 = vmatmul.mubr.f32.vlgmr.msra.gmra.mxu1 %v1846_v2  ;;  %1351 = vmatmul.mubr.msk.f32.vlgmr.msra.gmra.mxu0 %vm281_vm1, %v1572_v35  ;;  %v248_v49 = vld [vmem:[%s2315_s0 + $0x6e0] sm:$0xff]  ;;  %v110_v51 = vld [vmem:[%s2315_s0 + $0x290] sm:$0xff]  ;;  %v243_v52 = vld [vmem:[%s2315_s0 + $0x6b8] sm:$0xff] }
  0x52   :  { %587 = vmatprep.subr.mxu0 %v123_v42  ;;  %1352 = vmatprep.subr.msk.mxu1 %vm284_vm0, %v255_v43  ;;  %v105_v53 = vld [vmem:[%s2315_s0 + $0x268] sm:$0xff]  ;;  %v256_v54 = vld [vmem:[%s2317_s2] sm:$0x3]  ;;  %v242_v57 = vld [vmem:[%s2315_s0 + $0x6b0] sm:$0xff] }
  0x53   :  { %588 = vmatpush1.msra.mxu0 %v122_v44  ;;  %1353 = vmatpush1.msk.msra.mxu1 %vm284_vm0, %v254_v45  ;;  %v104_v55 = vld [vmem:[%s2315_s0 + $0x260] sm:$0xff]  ;;  %v99_v58 = vld [vmem:[%s2315_s0 + $0x238] sm:$0xff]  ;;  %v237_v59 = vld [vmem:[%s2315_s0 + $0x688] sm:$0xff] }
  0x54   :  { %589 = vmatprep.subr.mxu0 %v117_v46  ;;  %680 = vmatprep.subr.mxu1 %v249_v47  ;;  %v98_v60 = vld [vmem:[%s2315_s0 + $0x230] sm:$0xff]  ;;  %v236_v61 = vld [vmem:[%s2315_s0 + $0x680] sm:$0xff]  ;;  %v93_v62 = vld [vmem:[%s2315_s0 + $0x208] sm:$0xff] }
  0x55   :  { %590 = vmatpush1.msra.mxu0 %v116_v48  ;;  %681 = vmatpush1.msra.mxu1 %v248_v49  ;;  %v231_v63 = vld [vmem:[%s2315_s0 + $0x658] sm:$0xff]  ;;  %v92_v0 = vld [vmem:[%s2315_s0 + $0x200] sm:$0xff]  ;;  %v230_v1 = vld [vmem:[%s2315_s0 + $0x650] sm:$0xff] }
  0x56   :  { %591 = vmatprep.subr.mxu0 %v111_v50  ;;  %1396 = vset.pattern.permute.xlu0 %v1436_v56  ;;  %v87_v3 = vld [vmem:[%s2315_s0 + $0x1d8] sm:$0xff]  ;;  %v225_v4 = vld [vmem:[%s2315_s0 + $0x628] sm:$0xff]  ;;  %v86_v5 = vld [vmem:[%s2315_s0 + $0x1d0] sm:$0xff] }
  0x57   :  { %592 = vmatpush1.msra.mxu0 %v110_v51  ;;  %682 = vmatprep.subr.mxu1 %v243_v52  ;;  %v81_v27 = vld [vmem:[%s2315_s0 + $0x1a8] sm:$0xff]  ;;  %v224_v30 = vld [vmem:[%s2315_s0 + $0x620] sm:$0xff]  ;;  %v75_v7 = vld [vmem:[%s2315_s0 + $0x178] sm:$0xff] }
  0x58   :  { %593 = vmatprep.subr.mxu0 %v105_v53  ;;  %259 = vperm.xlu0 %1396, %v256_v54   ;;  %v80_v6 = vld [vmem:[%s2315_s0 + $0x1a0] sm:$0xff]  ;;  %v74_v8 = vld [vmem:[%s2315_s0 + $0x170] sm:$0xff]  ;;  %v69_v9 = vld [vmem:[%s2315_s0 + $0x148] sm:$0xff] }
  0x59   :  { %594 = vmatpush1.msra.mxu0 %v104_v55  ;;  %683 = vmatpush1.msra.mxu1 %v242_v57  ;;  %v68_v10 = vld [vmem:[%s2315_s0 + $0x140] sm:$0xff]  ;;  %v62_v12 = vld [vmem:[%s2315_s0 + $0x110] sm:$0xff]  ;;  %v57_v13 = vld [vmem:[%s2315_s0 + $0xe8] sm:$0xff] }
  0x5a   :  { %595 = vmatprep.subr.mxu0 %v99_v58  ;;  %684 = vmatprep.subr.mxu1 %v237_v59  ;;  %v51_v14 = vld [vmem:[%s2315_s0 + $0xb8] sm:$0xff]  ;;  %v50_v15 = vld [vmem:[%s2315_s0 + $0xb0] sm:$0xff]  ;;  %v45_v16 = vld [vmem:[%s2315_s0 + $0x88] sm:$0xff] }
  0x5b   :  { %596 = vmatpush1.msra.mxu0 %v98_v60  ;;  %685 = vmatpush1.msra.mxu1 %v236_v61  ;;  %v44_v17 = vld [vmem:[%s2315_s0 + $0x80] sm:$0xff]  ;;  %v39_v18 = vld [vmem:[%s2315_s0 + $0x58] sm:$0xff]  ;;  %v38_v19 = vld [vmem:[%s2315_s0 + $0x50] sm:$0xff] }
  0x5c   :  { %597 = vmatprep.subr.mxu0 %v93_v62  ;;  %686 = vmatprep.subr.mxu1 %v231_v63  ;;  %v33_v20 = vld [vmem:[%s2315_s0 + $0x28] sm:$0xff]  ;;  %v32_v21 = vld [vmem:[%s2315_s0 + $0x20] sm:$0xff]  ;;  %v219_v22 = vld [vmem:[%s2315_s0 + $0x5f8] sm:$0xff] }
  0x5d   :  { %598 = vmatpush1.msra.mxu0 %v92_v0  ;;  %687 = vmatpush1.msra.mxu1 %v230_v1  ;;  %v218_v23 = vld [vmem:[%s2315_s0 + $0x5f0] sm:$0xff]  ;;  %v213_v24 = vld [vmem:[%s2315_s0 + $0x5c8] sm:$0xff]  ;;  %v212_v25 = vld [vmem:[%s2315_s0 + $0x5c0] sm:$0xff] }
  0x5e   :  { %599 = vmatprep.subr.mxu0 %v87_v3  ;;  %688 = vmatprep.subr.mxu1 %v225_v4  ;;  %v207_v26 = vld [vmem:[%s2315_s0 + $0x598] sm:$0xff]  ;;  %v206_v28 = vld [vmem:[%s2315_s0 + $0x590] sm:$0xff]  ;;  %v201_v29 = vld [vmem:[%s2315_s0 + $0x568] sm:$0xff] }
  0x5f   :  { %600 = vmatpush1.msra.mxu0 %v86_v5  ;;  %651 = vmatprep.mubr.f32.mxu0 %v1880_v11  ;;  %v63_v11 = vld [vmem:[%s2315_s0 + $0x118] sm:$0xff]  ;;  %v200_v31 = vld [vmem:[%s2315_s0 + $0x560] sm:$0xff]  ;;  %v194_v33 = vld [vmem:[%s2315_s0 + $0x530] sm:$0xff] }
  0x60   :  { %601 = vmatprep.subr.mxu0 %v81_v27  ;;  %689 = vmatpush1.msra.mxu1 %v224_v30  ;;  %v195_v32 = vld [vmem:[%s2315_s0 + $0x538] sm:$0xff]  ;;  %v189_v34 = vld [vmem:[%s2315_s0 + $0x508] sm:$0xff]  ;;  %v188_v36 = vld [vmem:[%s2315_s0 + $0x500] sm:$0xff] }
  0x61   :  { %602 = vmatpush1.msra.mxu0 %v80_v6  ;;  %722 = vmatprep.mubr.f32.mxu1 %v1435_v37  ;;  %v183_v38 = vld [vmem:[%s2315_s0 + $0x4d8] sm:$0xff]  ;;  %v182_v39 = vld [vmem:[%s2315_s0 + $0x4d0] sm:$0xff]  ;;  %v177_v40 = vld [vmem:[%s2315_s0 + $0x4a8] sm:$0xff] }
  0x62   :  { %603 = vmatprep.subr.mxu0 %v75_v7  ;;  %1354 = vmatmul.mubr.msk.f32.vlgmr.msra.gmra.mxu1 %vm281_vm1, %v1572_v35  ;;  %v56_v35 = vld [vmem:[%s2315_s0 + $0xe0] sm:$0xff]  ;;  %v171_v42 = vld [vmem:[%s2315_s0 + $0x478] sm:$0xff]  ;;  %v170_v43 = vld [vmem:[%s2315_s0 + $0x470] sm:$0xff] }
  0x63   :  { %604 = vmatpush1.msra.mxu0 %v74_v8  ;;  %v176_v41 = vld [vmem:[%s2315_s0 + $0x4a0] sm:$0xff]  ;;  %v165_v44 = vld [vmem:[%s2315_s0 + $0x448] sm:$0xff]  ;;  %v159_v46 = vld [vmem:[%s2315_s0 + $0x418] sm:$0xff] }
  0x64   :  { %605 = vmatprep.subr.mxu0 %v69_v9  ;;  %v164_v45 = vld [vmem:[%s2315_s0 + $0x440] sm:$0xff]  ;;  %v158_v47 = vld [vmem:[%s2315_s0 + $0x410] sm:$0xff]  ;;  %v153_v48 = vld [vmem:[%s2315_s0 + $0x3e8] sm:$0xff] }
  0x65   :  { %606 = vmatpush1.msra.mxu0 %v68_v10  ;;  %v152_v49 = vld [vmem:[%s2315_s0 + $0x3e0] sm:$0xff]  ;;  %v147_v50 = vld [vmem:[%s2315_s0 + $0x3b8] sm:$0xff]  ;;  %v146_v51 = vld [vmem:[%s2315_s0 + $0x3b0] sm:$0xff] }
  0x66   :  { %607 = vmatprep.subr.mxu0 %v63_v11  ;;  %v141_v52 = vld [vmem:[%s2315_s0 + $0x388] sm:$0xff]  ;;  %v140_v53 = vld [vmem:[%s2315_s0 + $0x380] sm:$0xff]  ;;  %v135_v54 = vld [vmem:[%s2315_s0 + $0x358] sm:$0xff] }
  0x67   :  { %608 = vmatpush1.msra.mxu0 %v62_v12  ;;  %v134_v55 = vld [vmem:[%s2315_s0 + $0x350] sm:$0xff]  ;;  %v129_v56 = vld [vmem:[%s2315_s0 + $0x328] sm:$0xff]  ;;  %v128_v57 = vld [vmem:[%s2315_s0 + $0x320] sm:$0xff] }
  0x68   :  { %609 = vmatprep.subr.mxu0 %v57_v13  ;;  %v773_v58 = vld [vmem:[%s2318_s3 + $0x38] sm:$0xff]  ;;  %v772_v59 = vld [vmem:[%s2318_s3 + $0x30] sm:$0xff]  ;;  %v767_v60 = vld [vmem:[%s2318_s3 + $0x8] sm:$0xff] }
  0x69   :  { %610 = vmatpush1.msra.mxu0 %v56_v35  ;;  %816 = vmatprep.subr.mxu1 %v773_v58  ;;  %v766_v61 = vld [vmem:[%s2318_s3] sm:$0xff] }
  0x6a   :  { %611 = vmatprep.subr.mxu0 %v51_v14  ;;  %817 = vmatpush1.xpose.msra.mxu1 %v772_v59 }
  0x6b   :  { %612 = vmatpush1.msra.mxu0 %v50_v15  ;;  %818 = vmatprep.subr.mxu1 %v767_v60 }
  0x6c   :  { %613 = vmatprep.subr.mxu0 %v45_v16 }
  0x6d   :  { %614 = vmatpush1.msra.mxu0 %v44_v17 }
  0x6e   :  { %615 = vmatprep.subr.mxu0 %v39_v18  ;;  %819 = vmatpush1.xpose.msra.mxu1 %v766_v61 }
  0x6f   :  { %616 = vmatpush1.msra.mxu0 %v38_v19 }
  0x70   :  { %617 = vmatprep.subr.mxu0 %v33_v20 }
  0x71   :  { %618 = vmatpush1.msra.mxu0 %v32_v21 }
  0x72   :  { %619 = vmatprep.subr.mxu0 %v219_v22 }
  0x73   :  { %620 = vmatpush2.msra.mxu0 %v218_v23 }
  0x74   :  { %621 = vmatprep.subr.mxu0 %v213_v24 }
  0x75   :  { %622 = vmatpush2.msra.mxu0 %v212_v25 }
  0x76   :  { %623 = vmatprep.subr.mxu0 %v207_v26  ;;  %v774_v26 = vld [vmem:[%s2318_s3 + $0x40] sm:$0xff] }
  0x77   :  { %624 = vmatpush2.msra.mxu0 %v206_v28 }
  0x78   :  { %625 = vmatprep.subr.mxu0 %v201_v29  ;;  %v769_v29 = vld [vmem:[%s2318_s3 + $0x18] sm:$0xff] }
  0x79   :  { %626 = vmatpush2.msra.mxu0 %v200_v31  ;;  %v768_v31 = vld [vmem:[%s2318_s3 + $0x10] sm:$0xff] }
  0x7a   :  { %627 = vmatprep.subr.mxu0 %v195_v32  ;;  %v777_v32 = vld [vmem:[%s2318_s3 + $0x58] sm:$0xff] }
  0x7b   :  { %628 = vmatpush2.msra.mxu0 %v194_v33 }
  0x7c   :  { %629 = vmatprep.subr.mxu0 %v189_v34 }
  0x7d   :  { %630 = vmatpush2.msra.mxu0 %v188_v36 }
  0x7e   :  { %631 = vmatprep.subr.mxu0 %v183_v38 }
  0x7f   :  { %632 = vmatpush2.msra.mxu0 %v182_v39 }
  0x80   :  { %633 = vmatprep.subr.mxu0 %v177_v40  ;;  %v776_v40 = vld [vmem:[%s2318_s3 + $0x50] sm:$0xff] }
  0x81   :  { %634 = vmatpush2.msra.mxu0 %v176_v41 }
  0x82   :  { %635 = vmatprep.subr.mxu0 %v171_v42  ;;  %v771_v42 = vld [vmem:[%s2318_s3 + $0x28] sm:$0xff] }
  0x83   :  { %636 = vmatpush2.msra.mxu0 %v170_v43  ;;  %v770_v43 = vld [vmem:[%s2318_s3 + $0x20] sm:$0xff] }
  0x84   :  { %637 = vmatprep.subr.mxu0 %v165_v44  ;;  %v1371_v44 = vld [vmem:[%s2318_s3 + $0x98] sm:$0xff] }
  0x85   :  { %638 = vmatpush2.msra.mxu0 %v164_v45 }
  0x86   :  { %639 = vmatprep.subr.mxu0 %v159_v46 }
  0x87   :  { %640 = vmatpush2.msra.mxu0 %v158_v47 }
  0x88   :  { %641 = vmatprep.subr.mxu0 %v153_v48 }
  0x89   :  { %642 = vmatpush2.msra.mxu0 %v152_v49 }
  0x8a   :  { %643 = vmatprep.subr.mxu0 %v147_v50 }
  0x8b   :  { %644 = vmatpush2.msra.mxu0 %v146_v51 }
  0x8c   :  { %645 = vmatprep.subr.mxu0 %v141_v52 }
  0x8d   :  { %646 = vmatpush2.msra.mxu0 %v140_v53 }
  0x8e   :  { %647 = vmatprep.subr.mxu0 %v135_v54 }
  0x8f   :  { %648 = vmatpush2.msra.mxu0 %v134_v55 }
  0x90   :  { %649 = vmatprep.subr.mxu0 %v129_v56 }
  0x91   :  { %650 = vmatpush2.msra.mxu0 %v128_v57 }
  0x92   :  { %652 = vmatmul.mubr.f32.vlgmr.msra.gmra.mxu0 %v1846_v2  ;;  %v775_v2 = vld [vmem:[%s2318_s3 + $0x48] sm:$0xff] }
  0x93   :  { %886 = vmatprep.subr.mxu1 %v775_v2  ;;  %v1370_v2 = vld [vmem:[%s2318_s3 + $0x90] sm:$0xff] }
  0xd0   :  { %v440_v63 = vpop.f32.mrf.mxu1 }
  0xd2   :  { %v442_v4 = vpop.f32.mrf.mxu1 }
  0xd3   :  { %v2222_v62 = vpop.permute.xlu0 %259 }
 0x103   :  { %v369_v0 = vpop.f32.mrf.mxu0 }
 0x104   :  { %v370_v1 = vadd.f32 %v369_v0, %v2222_v62  ;;  %v1365_v0 = vld [vmem:[%s2318_s3 + $0x68] sm:$0xff] }
 0x105   :  { %v371_v3 = vpop.f32.mrf.mxu0 }
 0x106   :  { %v441_v5 = vadd.f32 %v440_v63, %v370_v1  ;;  %v372_v27 = vadd.f32 %v371_v3, %v2222_v62  ;;  %v1364_v1 = vld [vmem:[%s2318_s3 + $0x60] sm:$0xff]  ;;  %v1373_v3 = vld [vmem:[%s2318_s3 + $0xa8] sm:$0xff] }
 0x108   :  { %v735_v30 = vmin.f32 %v441_v5, 0.0  ;;  %v443_v6 = vadd.f32 %v442_v4, %v372_v27  ;;  %vm729_vm3 = vcmp.gt.f32.partialorder %v441_v5, 0.0 }
 0x10a   :  { %v741_v7 = vmul.f32 1.442695, %v735_v30  ;;  %v736_v8 = vmin.f32 %v443_v6, 0.0  ;;  %vm730_vm2 = vcmp.gt.f32.partialorder %v443_v6, 0.0  ;;  %v1367_v30 = vld [vmem:[%s2318_s3 + $0x78] sm:$0xff] }
 0x10c   :  { %1398 = vpow2.f32 %v741_v7  ;;  %v743_v9 = vmul.f32 1.442695, %v736_v8  ;;  %v1375_v7 = vld [vmem:[%s2318_s3 + $0xb8] sm:$0xff] }
 0x10e   :  { %1400 = vpow2.f32 %v743_v9  ;;  %v1374_v9 = vld [vmem:[%s2318_s3 + $0xb0] sm:$0xff] }
 0x111   :  { %v511_v10 = vpop.f32.mrf.mxu1  ;;  %v582_v11 = vpop.f32.mrf.mxu0 }
 0x112   :  { %v512_v12 = vadd.f32 %v511_v10, %v2222_v62 }
 0x113   :  { %v513_v13 = vpop.f32.mrf.mxu1  ;;  %v584_v15 = vpop.f32.mrf.mxu0 }
 0x114   :  { %v583_v35 = vadd.f32 %v582_v11, %v512_v12  ;;  %v514_v14 = vadd.f32 %v513_v13, %v2222_v62  ;;  %v1369_v11 = vld [vmem:[%s2318_s3 + $0x88] sm:$0xff]  ;;  %v1368_v12 = vld [vmem:[%s2318_s3 + $0x80] sm:$0xff] }
 0x116   :  { %v737_v16 = vmin.f32 %v583_v35, 0.0  ;;  %v585_v17 = vadd.f32 %v584_v15, %v514_v14  ;;  %vm731_vm6 = vcmp.gt.f32.partialorder %v583_v35, 0.0  ;;  %v1253_v14 = vld [vmem:[%s2320_s5] sm:$0xff] }
 0x118   :  { %v745_v18 = vmul.f32 1.442695, %v737_v16  ;;  %v738_v19 = vmin.f32 %v585_v17, 0.0  ;;  %vm732_vm5 = vcmp.gt.f32.partialorder %v585_v17, 0.0 }
 0x119   :  { %v1399_v20 = vpop.eup %1398 }
 0x11a   :  { %1402 = vpow2.f32 %v745_v18  ;;  %v747_v21 = vmul.f32 1.442695, %v738_v19  ;;  %v1355_v23 = vadd.f32 -1.0, %v1399_v20 }
 0x11b   :  { %v1401_v22 = vpop.eup %1400 }
 0x11c   :  { %1404 = vpow2.f32 %v747_v21  ;;  %v1356_v24 = vadd.f32 -1.0, %v1401_v22  ;;  %v2231_v28 = vsel %vm729_vm3, %v441_v5, %v1355_v23  ;;  %v1372_v5 = vld [vmem:[%s2318_s3 + $0xa0] sm:$0xff] }
 0x11d   :  { %v1017_v4 = vrot.slane %v2231_v28, 1 }
 0x11e   :  { %v760_v25 = vsel %vm730_vm2, %v443_v6, %v1356_v24  ;;  %v1366_v6 = vld [vmem:[%s2318_s3 + $0x70] sm:$0xff] }
 0x11f   :  { %852 = vmatprep.mubr.f32.mxu1 %v760_v25 }
 0x120   :  { %853 = vmatmul.mubr.f32.vlgmr.msra.gmra.mxu1 %v2231_v28  ;;  %v765_v28 = vld [vmem:[%s2319_s4] sm:$0x1]  ;;  %s1438_s4 = smov [#allocation2]  }
 0x121   :  { %887 = vmatpush1.xpose.msra.mxu1 %v774_v26  ;;  %s1338_s27 = sshll.u32 %s1438_s4, 4  ;;  %s1339_s27 = int_to_ptr.vmem [resolvable:$true] %s1338_s27 }
 0x122   :  { %888 = vmatprep.subr.mxu1 %v769_v29  ;;  %v724_v46 = vpop.f32.mrf.mxu1  ;;  %s1412_s28 = scalar_lea.vmem %s1339_s27, 16  ;;  %s1416_s29 = scalar_lea.vmem %s1339_s27, 32 }
 0x123   :  { %p1413_p0 = scmp.ne.s32.totalorder %s1339_s27, %s1412_s28  ;;  %p1417_p1 = scmp.lt.s32.totalorder %s1339_s27, %s1339_s27 }
 0x124   :  { %v726_v51 = vpop.f32.mrf.mxu1  ;;  %p1418_p2 = scmp.lt.s32.totalorder %s1416_s29, %s1412_s28 }
 0x125   :  { %889 = vmatpush1.xpose.msra.mxu1 %v768_v31 }
 0x126   :  { %1361 = vmatprep.subr.msk.mxu1 %vm778_vm4, %v777_v32  ;;  %p1419_p3 = por %p1418_p2, %p1417_p1 }
 0x127   :  { %v1403_v33 = vpop.eup %1402 }
 0x128   :  { %v1357_v36 = vadd.f32 -1.0, %v1403_v33  ;;  %p1420_p4 = pnand %p1419_p3, %p1413_p0 }
 0x129   :  { %v1405_v34 = vpop.eup %1404 }
 0x12a   :  { %v1358_v38 = vadd.f32 -1.0, %v1405_v34  ;;  %v761_v41 = vsel %vm731_vm6, %v583_v35, %v1357_v36  ;;  %v1254_v35 = vld [vmem:[%s2320_s5 + $0x8] sm:$0xff] }
 0x12b   :  { %v1019_v8 = vrot.slane %v761_v41, 1 }
 0x12c   :  { %v762_v39 = vsel %vm732_vm5, %v585_v17, %v1358_v38 }
 0x12d   :  { %922 = vmatprep.mubr.f32.mxu1 %v762_v39  ;;  %v1020_v27 = vrot.slane %v762_v39, 1 }
 0x12e   :  { %923 = vmatmul.mubr.f32.vlgmr.msra.gmra.mxu1 %v761_v41 }
 0x12f   :  { %957 = vmatpush1.xpose.msra.mxu1 %v776_v40 }
 0x130   :  { %1362 = vmatprep.subr.msk.mxu1 %vm778_vm4, %v771_v42  ;;  %v1255_v42 = vld [vmem:[%s2321_s6] sm:$0x1] }
 0x133   :  { %959 = vmatpush1.xpose.msra.mxu1 %v770_v43 }
 0x134   :  { %1064 = vmatprep.subr.mxu1 %v1371_v44 }
 0x152   :  { %v653_v45 = vpop.f32.mrf.mxu0 }
 0x153   :  { %v654_v47 = vadd.f32 %v653_v45, %v2222_v62 }
 0x154   :  { %v655_v48 = vpop.f32.mrf.mxu0 }
 0x155   :  { %v725_v49 = vadd.f32 %v724_v46, %v654_v47  ;;  %v656_v50 = vadd.f32 %v655_v48, %v2222_v62  ;;  %v1018_v62 = vrot.slane %v760_v25, 1 }
 0x157   :  { %v739_v52 = vmin.f32 %v725_v49, 0.0  ;;  %v727_v53 = vadd.f32 %v726_v51, %v656_v50  ;;  %vm733_vm8 = vcmp.gt.f32.partialorder %v725_v49, 0.0 }
 0x159   :  { %v749_v54 = vmul.f32 1.442695, %v739_v52  ;;  %v740_v55 = vmin.f32 %v727_v53, 0.0  ;;  %vm734_vm7 = vcmp.gt.f32.partialorder %v727_v53, 0.0 }
 0x15b   :  { %1406 = vpow2.f32 %v749_v54  ;;  %v751_v56 = vmul.f32 1.442695, %v740_v55 }
 0x15d   :  { %1408 = vpow2.f32 %v751_v56 }
 0x168   :  { %v1407_v57 = vpop.eup %1406 }
 0x169   :  { %v1359_v59 = vadd.f32 -1.0, %v1407_v57 }
 0x16a   :  { %v1409_v58 = vpop.eup %1408 }
 0x16b   :  { %v1360_v60 = vadd.f32 -1.0, %v1409_v58  ;;  %v763_v63 = vsel %vm733_vm8, %v725_v49, %v1359_v59 }
 0x16c   :  { %v1021_v13 = vrot.slane %v763_v63, 1 }
 0x16d   :  { %v764_v61 = vsel %vm734_vm7, %v727_v53, %v1360_v60 }
 0x16e   :  { %1363 = vmatprep.mubr.msk.f32.mxu1 %vm778_vm4, %v764_v61  ;;  %v1022_v10 = vrot.slane %v764_v61, 1 }
 0x16f   :  { %993 = vmatmul.mubr.f32.vlgmr.msra.gmra.mxu1 %v763_v63 }
 0x170   :  { %1065 = vmatpush1.xpose.msra.mxu1 %v1370_v2  ;;  %1100 = vmatprep.mubr.f32.mxu1 %v1018_v62 }
 0x171   :  { %1066 = vmatprep.subr.mxu1 %v1365_v0 }
 0x174   :  { %1067 = vmatpush1.xpose.msra.mxu1 %v1364_v1 }
 0x175   :  { %1134 = vmatprep.subr.mxu1 %v1373_v3 }
 0x177   :  { %1101 = vmatmul.mubr.f32.vlgmr.msra.gmra.mxu1 %v1017_v4 }
 0x178   :  { %1135 = vmatpush1.xpose.msra.mxu1 %v1372_v5  ;;  %1170 = vmatprep.mubr.f32.mxu1 %v1020_v27 }
 0x179   :  { %1136 = vmatprep.subr.mxu1 %v1367_v30 }
 0x17c   :  { %1137 = vmatpush1.xpose.msra.mxu1 %v1366_v6 }
 0x17d   :  { %1376 = vmatprep.subr.msk.mxu1 %vm778_vm4, %v1375_v7 }
 0x17f   :  { %1171 = vmatmul.mubr.f32.vlgmr.msra.gmra.mxu1 %v1019_v8 }
 0x180   :  { %1205 = vmatpush1.xpose.msra.mxu1 %v1374_v9  ;;  %1378 = vmatprep.mubr.msk.f32.mxu1 %vm778_vm4, %v1022_v10 }
 0x181   :  { %1377 = vmatprep.subr.msk.mxu1 %vm778_vm4, %v1369_v11 }
 0x184   :  { %1207 = vmatpush1.xpose.msra.mxu1 %v1368_v12 }
 0x185   :  { %1384 = vmatprep.subr.mxu1 %v1435_v37 }
 0x187   :  { %1241 = vmatmul.mubr.f32.vlgmr.msra.gmra.mxu1 %v1021_v13 }
 0x188   :  { %1385 = vmatpush3.msra.mxu1 %v1254_v35  ;;  %1388 = vmatprep.mubr.msk.f32.mxu1 %vm1437_vm9, %v1435_v37 }
 0x189   :  { %1386 = vmatprep.subr.mxu1 %v1435_v37 }
 0x18a   :  { %1387 = vmatpush3.msra.mxu1 %v1253_v14 }
 0x1e0   :  { %v854_v15 = vpop.f32.mrf.mxu1 }
 0x1e2   :  { %v856_v16 = vpop.f32.mrf.mxu1 }
 0x1ee   :  { %v924_v17 = vpop.f32.mrf.mxu1 }
 0x1ef   :  { %v925_v18 = vadd.f32 %v924_v17, %v854_v15 }
 0x1f0   :  { %v926_v19 = vpop.f32.mrf.mxu1 }
 0x22f   :  { %v994_v20 = vpop.f32.mrf.mxu1 }
 0x230   :  { %v995_v26 = vadd.f32 %v994_v20, %v925_v18 }
 0x231   :  { %v996_v21 = vpop.f32.mrf.mxu1 }
 0x232   :  { %v998_v37 = vadd.f32 %v995_v26, %v765_v28 }
 0x237   :  { %v1102_v22 = vpop.f32.mrf.mxu1 }
 0x239   :  { %v1104_v23 = vpop.f32.mrf.mxu1 }
 0x23f   :  { %v1172_v24 = vpop.f32.mrf.mxu1 }
 0x240   :  { %v1173_v29 = vadd.f32 %v1172_v24, %v1102_v22 }
 0x241   :  { %v1174_v25 = vpop.f32.mrf.mxu1 }
 0x247   :  { %v1242_v31 = vpop.f32.mrf.mxu1 }
 0x248   :  { %v1243_v32 = vadd.f32 %v1242_v31, %v1173_v29 }
 0x249   :  { %v1244_v33 = vpop.f32.mrf.mxu1 }
 0x24a   :  { %v1246_v34 = vadd.f32 %v1243_v32, %v998_v37 }
 0x24c   :  { %v1248_v36 = vmin.f32 %v1246_v34, 0.0  ;;  %vm1247_vm11 = vcmp.gt.f32.partialorder %v1246_v34, 0.0 }
 0x24e   :  { %v1249_v38 = vmul.f32 1.442695, %v1248_v36 }
 0x250   :  { %1410 = vpow2.f32 %v1249_v38 }
 0x25d   :  { %v1411_v39 = vpop.eup %1410 }
 0x25e   :  { %v1379_v40 = vadd.f32 -1.0, %v1411_v39 }
 0x260   :  { %v1252_v41 = vsel %vm1247_vm11, %v1246_v34, %v1379_v40 }
 0x261   :  { %1389 = vmatmul.mubr.msk.f32.vlgmr.msra.gmra.mxu1 %vm1256_vm10, %v1252_v41 }
 0x321   :  { %v1326_v43 = vpop.f32.mrf.mxu1 }
 0x322   :  { %v1327_v44 = vadd.f32 %v1326_v43, %v1255_v42 }
 0x323   :  { %v1390_v45 = vpop.f32.mrf.mxu1 }
 0x324   :  { %1331 = vst.msk [vmem:[#allocation2] sm:$0x1] %vm1330_vm12, %v1327_v44 }
 0x325   :  { %1423 = shalt.err (!%p1420_p4)
}
 0x326   :  { %1341 = dma.vmem_to_hbm [thread:$0]  %s1339_s27, 16, %s2322_s7, [#allocation3]  }
 0x327   :  { %1432 = dma.done.wait [#allocation3], 16  }
 0x328   :  { %1433 = vsyncadd [#allocation3], 4294967280 }
 0x329   :  { %1345 = vsyncpa [#allocation3], 1 }

</bundles_post_ra>
